<compile_context>
chip_gen: v6e
topology: v6e:2x2x1
jax: 0.10.0
libtpu: 0.0.40
codegen_flags: <defaults>
</compile_context>

<pallas_src>
import jax
import jax.numpy as jnp
from jax.experimental import pallas as pl
from jax.experimental.pallas import tpu as pltpu

HIDDEN_DIM = 64
_VMEM_LIMIT_BYTES = 32 * 1024 * 1024      # <= every generation's physical VMEM
_X_TILE_VMEM_BUDGET = 16 * 1024 * 1024    # budget for the double-buffered x tile


def _round_up(n, m):
    return ((n + m - 1) // m) * m


def _cdiv(a, b):
    return (a + b - 1) // b


def _leaky_relu(x, slope=0.2):
    return jnp.where(x > 0, x, slope * x)


def _choose_tile_b(batch, feat_dim, in_bytes, requested=1024,
                   x_buf_budget=_X_TILE_VMEM_BUDGET):
    """Lane-friendly batch tile: multiple of 128, VMEM-aware, balanced grid."""
    b128 = _round_up(batch, 128)
    t = min(_round_up(max(requested, 128), 128), b128)
    # Two pipeline buffers of the (t, feat_dim) x tile must fit the budget.
    per_row = 2 * feat_dim * in_bytes
    t_cap = max(128, (x_buf_budget // max(per_row, 1)) // 128 * 128)
    t = min(t, t_cap)
    # >= 2 balanced grid steps when the batch spans more than one 128-row chunk
    # (keeps both v7x TensorCores busy and avoids a lopsided tail tile).
    if b128 > 128:
        steps = max(2, _cdiv(b128, t))
        t = min(t, _round_up(_cdiv(b128, steps), 128))
    return t


def discriminator_kernel(x_ref, w1_ref, b1_ref, w2_ref, b2_ref, w3_ref, b3_ref,
                         o_ref):
    """Fused 3-layer MLP forward for one batch tile (batch-on-lanes layout).

    x_ref : (TB, D)   input tile (batch on sublanes, as stored in HBM)
    w1    : (H, D)    b1 : (H, 1)     (PyTorch (out, in) layout)
    w2    : (H, H)    b2 : (H, 1)
    w3    : (H, 1)    b3 : (1,) in SMEM
    o_ref : (1, TB)   lane-dense sigmoid outputs for this tile
    """
    cdt = w1_ref.dtype  # MXU input dtype (f32 or bf16)

    x = x_ref[...]
    if x.dtype != cdt:          # static (trace-time) branch; in-register cast
        x = x.astype(cdt)

    # Layer 1: (H, D) x (TB, D)^T -> (H, TB).  The transpose is folded into the
    # contraction (both operands contract their last dim) -> no (D, TB) temp.
    h = jax.lax.dot_general(
        w1_ref[...], x,
        dimension_numbers=(((1,), (1,)), ((), ())),
        preferred_element_type=jnp.float32)
    h = _leaky_relu(h + b1_ref[...])                                   # f32 (H, TB)

    # Layer 2: (H, H) x (H, TB) -> (H, TB), f32 accumulation on the MXU.
    h = jnp.dot(w2_ref[...], h.astype(cdt),
                preferred_element_type=jnp.float32)
    h = _leaky_relu(h + b2_ref[...])                                   # f32 (H, TB)

    # Layer 3 (M=1): VPU broadcast-multiply + sublane reduction over H — avoids
    # an MXU push/pop round-trip for a degenerate single-row matmul.
    logits = jnp.sum(w3_ref[...] * h, axis=0, keepdims=True) + b3_ref[0]

    # sigmoid(x) = 0.5 * (tanh(0.5 x) + 1): a single EUP push per element.
    o_ref[...] = (0.5 * (jnp.tanh(0.5 * logits) + 1.0)).astype(o_ref.dtype)


def discriminator_forward(x, params, *, tile_b=1024, compute_dtype=None):
    """x: [B, input_dim] -> [B, 1] float32 (matches the PyTorch module).

    compute_dtype: dtype fed to the MXU.  Defaults to bf16 only when x is
    already bf16-resident (so the HBM stream is genuinely halved); otherwise
    f32 x stays in HBM untouched and is (optionally) cast in-kernel.
    """
    B, D = x.shape
    w1, b1, w2, b2, w3, b3 = params
    H = w1.shape[0]

    if compute_dtype is None:
        compute_dtype = jnp.bfloat16 if x.dtype == jnp.dtype(jnp.bfloat16) else jnp.float32
    compute_dtype = jnp.dtype(compute_dtype)

    tb = _choose_tile_b(B, D, x.dtype.itemsize, tile_b)
    num_tiles = _cdiv(B, tb)

    # Weights/biases are tiny -> cast/reshape them in the wrapper (never x).
    w1c = w1.astype(compute_dtype)
    w2c = w2.astype(compute_dtype)
    b1c = b1.astype(jnp.float32).reshape(H, 1)
    b2c = b2.astype(jnp.float32).reshape(H, 1)
    w3c = w3.astype(jnp.float32).reshape(H, 1)   # column layout for VPU epilogue
    b3c = b3.astype(jnp.float32).reshape(1)

    # Single-buffer the replicated (constant index map) weight/bias blocks.
    single_buf = None
    if hasattr(pl, "Buffered"):
        try:
            single_buf = pl.Buffered(1)
        except Exception:
            single_buf = None

    def make_call(weight_pipeline_mode):
        wkw = ({"pipeline_mode": weight_pipeline_mode}
               if weight_pipeline_mode is not None else {})
        rep = lambda i: (0, 0)
        in_specs = [
            pl.BlockSpec((tb, D), lambda i: (i, 0)),                 # x tile
            pl.BlockSpec((H, D), rep, **wkw),                        # w1
            pl.BlockSpec((H, 1), rep, **wkw),                        # b1
            pl.BlockSpec((H, H), rep, **wkw),                        # w2
            pl.BlockSpec((H, 1), rep, **wkw),                        # b2
            pl.BlockSpec((H, 1), rep, **wkw),                        # w3 (column)
            pl.BlockSpec(memory_space=pltpu.MemorySpace.SMEM),       # b3 scalar
        ]
        return pl.pallas_call(
            discriminator_kernel,
            out_shape=jax.ShapeDtypeStruct((1, B), jnp.float32),
            grid_spec=pltpu.PrefetchScalarGridSpec(
                num_scalar_prefetch=0,
                grid=(num_tiles,),
                in_specs=in_specs,
                out_specs=pl.BlockSpec((1, tb), lambda i: (0, i)),   # lane-dense
            ),
            compiler_params=pltpu.CompilerParams(
                dimension_semantics=("parallel",),
                vmem_limit_bytes=_VMEM_LIMIT_BYTES),
        )

    args = (x, w1c, b1c, w2c, b2c, w3c, b3c)
    if single_buf is not None:
        try:
            out_row = make_call(single_buf)(*args)
        except Exception:
            # Older JAX / lowering without pipeline_mode support: plain specs.
            out_row = make_call(None)(*args)
    else:
        out_row = make_call(None)(*args)

    return out_row.reshape(B, 1)


def init_discriminator_params(key, input_dim, hidden_dim=HIDDEN_DIM):
    """PyTorch nn.Linear-style init, weights kept in (out_features, in_features)."""
    def linear(key, fan_in, fan_out):
        kw, kb = jax.random.split(key)
        bound = 1.0 / jnp.sqrt(float(fan_in))
        w = jax.random.uniform(kw, (fan_out, fan_in), jnp.float32, -bound, bound)
        b = jax.random.uniform(kb, (fan_out,), jnp.float32, -bound, bound)
        return w, b

    k1, k2, k3 = jax.random.split(key, 3)
    w1, b1 = linear(k1, input_dim, hidden_dim)
    w2, b2 = linear(k2, hidden_dim, hidden_dim)
    w3, b3 = linear(k3, hidden_dim, 1)
    return (w1, b1, w2, b2, w3, b3)


def discriminator_reference(x, params):
    """Pure-JAX reference (matches the PyTorch module)."""
    w1, b1, w2, b2, w3, b3 = params
    x = x.astype(jnp.float32)
    h = x @ w1.T + b1
    h = jnp.where(h > 0, h, 0.2 * h)
    h = h @ w2.T + b2
    h = jnp.where(h > 0, h, 0.2 * h)
    return jax.nn.sigmoid(h @ w3.T + b3)


if __name__ == "__main__":
    key = jax.random.PRNGKey(0)
    k_params, k_x = jax.random.split(key)

    INPUT_DIM = 32
    params = init_discriminator_params(k_params, INPUT_DIM)

    # f32 path: batch=10 exercises a single masked partial tile; batch=300
    # exercises a 2-step balanced grid with a masked tail tile.
    for batch in (10, 300):
        kx = jax.random.fold_in(k_x, batch)
        x = jax.random.normal(kx, (batch, INPUT_DIM), jnp.float32)
        ref = discriminator_reference(x, params)
        out = jax.block_until_ready(discriminator_forward(x, params))
        assert out.shape == (batch, 1)
        assert jnp.allclose(out, ref, atol=5e-3, rtol=5e-3), \
            f"f32 mismatch vs reference (batch={batch})"

    # bf16-resident input path (only here does bf16 actually halve HBM traffic).
    xb = jax.random.normal(k_x, (300, INPUT_DIM), jnp.float32).astype(jnp.bfloat16)
    ref_bf = discriminator_reference(xb, params)
    out_bf = jax.block_until_ready(discriminator_forward(xb, params))
    assert out_bf.shape == (300, 1)
    assert jnp.allclose(out_bf, ref_bf, atol=5e-2, rtol=5e-2), \
        "bf16 mismatch vs reference"

    print("KERNEL_OK")
</pallas_src>

<mosaic_0001>
module attributes {stable_mosaic.version = 11 : i64} {
  func.func @discriminator_kernel(%arg0: i32, %arg1: memref<128x32xf32, #tpu.memory_space<vmem>>, %arg2: memref<64x32xf32, #tpu.memory_space<vmem>>, %arg3: memref<64x1xf32, #tpu.memory_space<vmem>>, %arg4: memref<64x64xf32, #tpu.memory_space<vmem>>, %arg5: memref<64x1xf32, #tpu.memory_space<vmem>>, %arg6: memref<64x1xf32, #tpu.memory_space<vmem>>, %arg7: memref<1xf32, #tpu.memory_space<smem>>, %arg8: memref<1x128xf32, #tpu.memory_space<vmem>>) attributes {dimension_semantics = [#tpu.dimension_semantics<parallel>], iteration_bounds = array<i64: 1>, scalar_prefetch = 0 : i64, scratch_operands = 0 : i64, tpu.core_type = #tpu.core_type<tc>, window_params = [{transform_indices = @transform_0, window_bounds = array<i64: 128, 32>}, {pipeline_mode = #tpu.pipeline_mode<synchronous>, transform_indices = @transform_1, window_bounds = array<i64: 64, 32>}, {pipeline_mode = #tpu.pipeline_mode<synchronous>, transform_indices = @transform_2, window_bounds = array<i64: 64, 1>}, {pipeline_mode = #tpu.pipeline_mode<synchronous>, transform_indices = @transform_3, window_bounds = array<i64: 64, 64>}, {pipeline_mode = #tpu.pipeline_mode<synchronous>, transform_indices = @transform_4, window_bounds = array<i64: 64, 1>}, {pipeline_mode = #tpu.pipeline_mode<synchronous>, transform_indices = @transform_5, window_bounds = array<i64: 64, 1>}, {transform_indices = @transform_6, window_bounds = array<i64: 1>}, {transform_indices = @transform_7, window_bounds = array<i64: 1, 128>}]} {
    %c0 = arith.constant 0 : index
    %c0_0 = arith.constant 0 : index
    %0 = vector.load %arg1[%c0, %c0_0] : memref<128x32xf32, #tpu.memory_space<vmem>>, vector<128x32xf32>
    %c0_1 = arith.constant 0 : index
    %c0_2 = arith.constant 0 : index
    %1 = vector.load %arg2[%c0_1, %c0_2] : memref<64x32xf32, #tpu.memory_space<vmem>>, vector<64x32xf32>
    %cst = arith.constant dense<0.000000e+00> : vector<64x128xf32>
    %2 = tpu.matmul %1, %0, %cst {dimension_numbers = #tpu.dot_dimension_numbers<[1], [1], [0], [0], [0, 0, 1, 0], [], []>} : vector<64x32xf32>, vector<128x32xf32>, vector<64x128xf32> -> vector<64x128xf32>
    %c0_3 = arith.constant 0 : index
    %c0_4 = arith.constant 0 : index
    %3 = vector.load %arg3[%c0_3, %c0_4] : memref<64x1xf32, #tpu.memory_space<vmem>>, vector<64x1xf32>
    %4 = vector.broadcast %3 : vector<64x1xf32> to vector<64x128xf32>
    %5 = arith.addf %2, %4 : vector<64x128xf32>
    %cst_5 = arith.constant 0.000000e+00 : f32
    %6 = vector.broadcast %cst_5 : f32 to vector<64x128xf32>
    %7 = arith.cmpf ogt, %5, %6 : vector<64x128xf32>
    %cst_6 = arith.constant 2.000000e-01 : f32
    %8 = vector.broadcast %cst_6 : f32 to vector<64x128xf32>
    %9 = arith.mulf %8, %5 : vector<64x128xf32>
    %10 = arith.select %7, %5, %9 : vector<64x128xi1>, vector<64x128xf32>
    %c0_7 = arith.constant 0 : index
    %c0_8 = arith.constant 0 : index
    %11 = vector.load %arg4[%c0_7, %c0_8] : memref<64x64xf32, #tpu.memory_space<vmem>>, vector<64x64xf32>
    %cst_9 = arith.constant dense<0.000000e+00> : vector<64x128xf32>
    %12 = tpu.matmul %11, %10, %cst_9 {dimension_numbers = #tpu.dot_dimension_numbers<[1], [0], [0], [1], [0, 0, 1, 1], [], []>} : vector<64x64xf32>, vector<64x128xf32>, vector<64x128xf32> -> vector<64x128xf32>
    %c0_10 = arith.constant 0 : index
    %c0_11 = arith.constant 0 : index
    %13 = vector.load %arg5[%c0_10, %c0_11] : memref<64x1xf32, #tpu.memory_space<vmem>>, vector<64x1xf32>
    %14 = vector.broadcast %13 : vector<64x1xf32> to vector<64x128xf32>
    %15 = arith.addf %12, %14 : vector<64x128xf32>
    %cst_12 = arith.constant 0.000000e+00 : f32
    %16 = vector.broadcast %cst_12 : f32 to vector<64x128xf32>
    %17 = arith.cmpf ogt, %15, %16 : vector<64x128xf32>
    %cst_13 = arith.constant 2.000000e-01 : f32
    %18 = vector.broadcast %cst_13 : f32 to vector<64x128xf32>
    %19 = arith.mulf %18, %15 : vector<64x128xf32>
    %20 = arith.select %17, %15, %19 : vector<64x128xi1>, vector<64x128xf32>
    %c0_14 = arith.constant 0 : index
    %c0_15 = arith.constant 0 : index
    %21 = vector.load %arg6[%c0_14, %c0_15] : memref<64x1xf32, #tpu.memory_space<vmem>>, vector<64x1xf32>
    %22 = vector.broadcast %21 : vector<64x1xf32> to vector<64x128xf32>
    %23 = arith.mulf %22, %20 : vector<64x128xf32>
    %cst_16 = arith.constant dense<0.000000e+00> : vector<128xf32>
    %24 = vector.multi_reduction <add>, %23, %cst_16 [0] : vector<64x128xf32> to vector<128xf32>
    %25 = vector.shape_cast %24 : vector<128xf32> to vector<1x128xf32>
    %c0_17 = arith.constant 0 : index
    %26 = memref.load %arg7[%c0_17] : memref<1xf32, #tpu.memory_space<smem>>
    %27 = vector.broadcast %26 : f32 to vector<1x128xf32>
    %28 = arith.addf %25, %27 : vector<1x128xf32>
    %cst_18 = arith.constant 5.000000e-01 : f32
    %29 = vector.broadcast %cst_18 : f32 to vector<1x128xf32>
    %30 = arith.mulf %29, %28 : vector<1x128xf32>
    %31 = math.tanh %30 : vector<1x128xf32>
    %cst_19 = arith.constant 1.000000e+00 : f32
    %32 = vector.broadcast %cst_19 : f32 to vector<1x128xf32>
    %33 = arith.addf %31, %32 : vector<1x128xf32>
    %cst_20 = arith.constant 5.000000e-01 : f32
    %34 = vector.broadcast %cst_20 : f32 to vector<1x128xf32>
    %35 = arith.mulf %34, %33 : vector<1x128xf32>
    %c0_21 = arith.constant 0 : index
    %c0_22 = arith.constant 0 : index
    %36 = vector.load %arg8[%c0_21, %c0_22] : memref<1x128xf32, #tpu.memory_space<vmem>>, vector<1x128xf32>
    tpu.vector_store %arg8[%c0_21, %c0_22], %35 {strides = array<i32>} : memref<1x128xf32, #tpu.memory_space<vmem>>, vector<1x128xf32>,
    return
  }
  func.func @transform_0(%arg0: i32) -> (i32, i32) {
    %c0_i32 = arith.constant 0 : i32
    %c0_i32_0 = arith.constant 0 : i32
    return %arg0, %c0_i32 : i32, i32
  }
  func.func @transform_1(%arg0: i32) -> (i32, i32) {
    %c0_i32 = arith.constant 0 : i32
    %c0_i32_0 = arith.constant 0 : i32
    %c0_i32_1 = arith.constant 0 : i32
    return %c0_i32, %c0_i32_0 : i32, i32
  }
  func.func @transform_2(%arg0: i32) -> (i32, i32) {
    %c0_i32 = arith.constant 0 : i32
    %c0_i32_0 = arith.constant 0 : i32
    %c0_i32_1 = arith.constant 0 : i32
    return %c0_i32, %c0_i32_0 : i32, i32
  }
  func.func @transform_3(%arg0: i32) -> (i32, i32) {
    %c0_i32 = arith.constant 0 : i32
    %c0_i32_0 = arith.constant 0 : i32
    %c0_i32_1 = arith.constant 0 : i32
    return %c0_i32, %c0_i32_0 : i32, i32
  }
  func.func @transform_4(%arg0: i32) -> (i32, i32) {
    %c0_i32 = arith.constant 0 : i32
    %c0_i32_0 = arith.constant 0 : i32
    %c0_i32_1 = arith.constant 0 : i32
    return %c0_i32, %c0_i32_0 : i32, i32
  }
  func.func @transform_5(%arg0: i32) -> (i32, i32) {
    %c0_i32 = arith.constant 0 : i32
    %c0_i32_0 = arith.constant 0 : i32
    %c0_i32_1 = arith.constant 0 : i32
    return %c0_i32, %c0_i32_0 : i32, i32
  }
  func.func @transform_6(%arg0: i32) -> i32 {
    %c0_i32 = arith.constant 0 : i32
    %c0_i32_0 = arith.constant 0 : i32
    return %c0_i32 : i32
  }
  func.func @transform_7(%arg0: i32) -> (i32, i32) {
    %c0_i32 = arith.constant 0 : i32
    %c0_i32_0 = arith.constant 0 : i32
    return %c0_i32, %arg0 : i32, i32
  }
}

module attributes {stable_mosaic.version = 11 : i64} {
  func.func @discriminator_kernel(%arg0: i32, %arg1: memref<128x32xf32, #tpu.memory_space<vmem>>, %arg2: memref<64x32xf32, #tpu.memory_space<vmem>>, %arg3: memref<64x1xf32, #tpu.memory_space<vmem>>, %arg4: memref<64x64xf32, #tpu.memory_space<vmem>>, %arg5: memref<64x1xf32, #tpu.memory_space<vmem>>, %arg6: memref<64x1xf32, #tpu.memory_space<vmem>>, %arg7: memref<1xf32, #tpu.memory_space<smem>>, %arg8: memref<1x128xf32, #tpu.memory_space<vmem>>) attributes {dimension_semantics = [#tpu.dimension_semantics<parallel>], iteration_bounds = array<i64: 1>, scalar_prefetch = 0 : i64, scratch_operands = 0 : i64, tpu.core_type = #tpu.core_type<tc>, window_params = [{transform_indices = @transform_0, window_bounds = array<i64: 128, 32>}, {pipeline_mode = #tpu.pipeline_mode<synchronous>, transform_indices = @transform_1, window_bounds = array<i64: 64, 32>}, {pipeline_mode = #tpu.pipeline_mode<synchronous>, transform_indices = @transform_2, window_bounds = array<i64: 64, 1>}, {pipeline_mode = #tpu.pipeline_mode<synchronous>, transform_indices = @transform_3, window_bounds = array<i64: 64, 64>}, {pipeline_mode = #tpu.pipeline_mode<synchronous>, transform_indices = @transform_4, window_bounds = array<i64: 64, 1>}, {pipeline_mode = #tpu.pipeline_mode<synchronous>, transform_indices = @transform_5, window_bounds = array<i64: 64, 1>}, {transform_indices = @transform_6, window_bounds = array<i64: 1>}, {transform_indices = @transform_7, window_bounds = array<i64: 1, 128>}]} {
    %c0 = arith.constant 0 : index
    %c0_0 = arith.constant 0 : index
    %0 = vector.load %arg1[%c0, %c0_0] : memref<128x32xf32, #tpu.memory_space<vmem>>, vector<128x32xf32>
    %c0_1 = arith.constant 0 : index
    %c0_2 = arith.constant 0 : index
    %1 = vector.load %arg2[%c0_1, %c0_2] : memref<64x32xf32, #tpu.memory_space<vmem>>, vector<64x32xf32>
    %cst = arith.constant dense<0.000000e+00> : vector<64x128xf32>
    %2 = tpu.matmul %1, %0, %cst {dimension_numbers = #tpu.dot_dimension_numbers<[1], [1], [0], [0], [0, 0, 1, 0], [], []>} : vector<64x32xf32>, vector<128x32xf32>, vector<64x128xf32> -> vector<64x128xf32>
    %c0_3 = arith.constant 0 : index
    %c0_4 = arith.constant 0 : index
    %3 = vector.load %arg3[%c0_3, %c0_4] : memref<64x1xf32, #tpu.memory_space<vmem>>, vector<64x1xf32>
    %4 = vector.broadcast %3 : vector<64x1xf32> to vector<64x128xf32>
    %5 = arith.addf %2, %4 : vector<64x128xf32>
    %cst_5 = arith.constant 0.000000e+00 : f32
    %6 = vector.broadcast %cst_5 : f32 to vector<64x128xf32>
    %7 = arith.cmpf ogt, %5, %6 : vector<64x128xf32>
    %cst_6 = arith.constant 2.000000e-01 : f32
    %8 = vector.broadcast %cst_6 : f32 to vector<64x128xf32>
    %9 = arith.mulf %8, %5 : vector<64x128xf32>
    %10 = arith.select %7, %5, %9 : vector<64x128xi1>, vector<64x128xf32>
    %c0_7 = arith.constant 0 : index
    %c0_8 = arith.constant 0 : index
    %11 = vector.load %arg4[%c0_7, %c0_8] : memref<64x64xf32, #tpu.memory_space<vmem>>, vector<64x64xf32>
    %cst_9 = arith.constant dense<0.000000e+00> : vector<64x128xf32>
    %12 = tpu.matmul %11, %10, %cst_9 {dimension_numbers = #tpu.dot_dimension_numbers<[1], [0], [0], [1], [0, 0, 1, 1], [], []>} : vector<64x64xf32>, vector<64x128xf32>, vector<64x128xf32> -> vector<64x128xf32>
    %c0_10 = arith.constant 0 : index
    %c0_11 = arith.constant 0 : index
    %13 = vector.load %arg5[%c0_10, %c0_11] : memref<64x1xf32, #tpu.memory_space<vmem>>, vector<64x1xf32>
    %14 = vector.broadcast %13 : vector<64x1xf32> to vector<64x128xf32>
    %15 = arith.addf %12, %14 : vector<64x128xf32>
    %cst_12 = arith.constant 0.000000e+00 : f32
    %16 = vector.broadcast %cst_12 : f32 to vector<64x128xf32>
    %17 = arith.cmpf ogt, %15, %16 : vector<64x128xf32>
    %cst_13 = arith.constant 2.000000e-01 : f32
    %18 = vector.broadcast %cst_13 : f32 to vector<64x128xf32>
    %19 = arith.mulf %18, %15 : vector<64x128xf32>
    %20 = arith.select %17, %15, %19 : vector<64x128xi1>, vector<64x128xf32>
    %c0_14 = arith.constant 0 : index
    %c0_15 = arith.constant 0 : index
    %21 = vector.load %arg6[%c0_14, %c0_15] : memref<64x1xf32, #tpu.memory_space<vmem>>, vector<64x1xf32>
    %22 = vector.broadcast %21 : vector<64x1xf32> to vector<64x128xf32>
    %23 = arith.mulf %22, %20 : vector<64x128xf32>
    %cst_16 = arith.constant dense<0.000000e+00> : vector<128xf32>
    %24 = vector.multi_reduction <add>, %23, %cst_16 [0] : vector<64x128xf32> to vector<128xf32>
    %25 = vector.shape_cast %24 : vector<128xf32> to vector<1x128xf32>
    %c0_17 = arith.constant 0 : index
    %26 = memref.load %arg7[%c0_17] : memref<1xf32, #tpu.memory_space<smem>>
    %27 = vector.broadcast %26 : f32 to vector<1x128xf32>
    %28 = arith.addf %25, %27 : vector<1x128xf32>
    %cst_18 = arith.constant 5.000000e-01 : f32
    %29 = vector.broadcast %cst_18 : f32 to vector<1x128xf32>
    %30 = arith.mulf %29, %28 : vector<1x128xf32>
    %31 = math.tanh %30 : vector<1x128xf32>
    %cst_19 = arith.constant 1.000000e+00 : f32
    %32 = vector.broadcast %cst_19 : f32 to vector<1x128xf32>
    %33 = arith.addf %31, %32 : vector<1x128xf32>
    %cst_20 = arith.constant 5.000000e-01 : f32
    %34 = vector.broadcast %cst_20 : f32 to vector<1x128xf32>
    %35 = arith.mulf %34, %33 : vector<1x128xf32>
    %c0_21 = arith.constant 0 : index
    %c0_22 = arith.constant 0 : index
    %36 = vector.load %arg8[%c0_21, %c0_22] : memref<1x128xf32, #tpu.memory_space<vmem>>, vector<1x128xf32>
    tpu.vector_store %arg8[%c0_21, %c0_22], %35 {strides = array<i32>} : memref<1x128xf32, #tpu.memory_space<vmem>>, vector<1x128xf32>,
    return
  }
  func.func @transform_0(%arg0: i32) -> (i32, i32) {
    %c0_i32 = arith.constant 0 : i32
    %c0_i32_0 = arith.constant 0 : i32
    return %arg0, %c0_i32 : i32, i32
  }
  func.func @transform_1(%arg0: i32) -> (i32, i32) {
    %c0_i32 = arith.constant 0 : i32
    %c0_i32_0 = arith.constant 0 : i32
    %c0_i32_1 = arith.constant 0 : i32
    return %c0_i32, %c0_i32_0 : i32, i32
  }
  func.func @transform_2(%arg0: i32) -> (i32, i32) {
    %c0_i32 = arith.constant 0 : i32
    %c0_i32_0 = arith.constant 0 : i32
    %c0_i32_1 = arith.constant 0 : i32
    return %c0_i32, %c0_i32_0 : i32, i32
  }
  func.func @transform_3(%arg0: i32) -> (i32, i32) {
    %c0_i32 = arith.constant 0 : i32
    %c0_i32_0 = arith.constant 0 : i32
    %c0_i32_1 = arith.constant 0 : i32
    return %c0_i32, %c0_i32_0 : i32, i32
  }
  func.func @transform_4(%arg0: i32) -> (i32, i32) {
    %c0_i32 = arith.constant 0 : i32
    %c0_i32_0 = arith.constant 0 : i32
    %c0_i32_1 = arith.constant 0 : i32
    return %c0_i32, %c0_i32_0 : i32, i32
  }
  func.func @transform_5(%arg0: i32) -> (i32, i32) {
    %c0_i32 = arith.constant 0 : i32
    %c0_i32_0 = arith.constant 0 : i32
    %c0_i32_1 = arith.constant 0 : i32
    return %c0_i32, %c0_i32_0 : i32, i32
  }
  func.func @transform_6(%arg0: i32) -> i32 {
    %c0_i32 = arith.constant 0 : i32
    %c0_i32_0 = arith.constant 0 : i32
    return %c0_i32 : i32
  }
  func.func @transform_7(%arg0: i32) -> (i32, i32) {
    %c0_i32 = arith.constant 0 : i32
    %c0_i32_0 = arith.constant 0 : i32
    return %c0_i32, %arg0 : i32, i32
  }
}

</mosaic_0001>

<bundles_post_ra>
// kernel: tpu_custom_call.1
= control target key start
LH: loop header
LB: loop body
LE: loop exit
PB: predicated region body
PF: predicated region fallthrough
CT: control target
= control target key end

     0   :  { %vm100_vm0 = vcmask 261120   ;;  %v775_v2 = vmov 0   ;;  %s1039_s0 = inlined_call_operand.vmem [shape: f32[10,32], index: 0, kind: input, shape index: {}]   ;;  %s1040_s1 = inlined_call_operand.vmem [shape: f32[64,32], index: 1, kind: input, shape index: {}]   ;;  %s1041_s2 = inlined_call_operand.vmem [shape: f32[64,1], index: 2, kind: input, shape index: {}]   ;;  %s1042_s3 = inlined_call_operand.vmem [shape: f32[64,64], index: 3, kind: input, shape index: {}]   ;;  %s1043_s4 = inlined_call_operand.vmem [shape: f32[64,1], index: 4, kind: input, shape index: {}]   ;;  %s1044_s5 = inlined_call_operand.vmem [shape: f32[64,1], index: 5, kind: input, shape index: {}]   ;;  %s1045_s6 = inlined_call_operand.<no memory space> [shape: f32[1], index: 6, kind: input, shape index: {}]   ;;  %s1046_s7 = inlined_call_operand.hbm [shape: f32[1,10], index: 7, kind: output, shape index: {}]  }
   0x1   :  { %v43_v0 = vld [vmem:[%s1039_s0 + $0x78] sm:$0xff]  ;;  %v42_v1 = vld [vmem:[%s1039_s0 + $0x70] sm:$0xff]  ;;  %749 = vset.pattern.permute.xlu0 %v775_v2  ;;  %750 = vset.pattern.permute.xlu1 %v775_v2  ;;  %v41_v3 = vld [vmem:[%s1039_s0 + $0x68] sm:$0xff] }
   0x2   :  { %675 = vmatprep.subr.msk.mxu0 %vm100_vm0, %v43_v0  ;;  %v44_v4 = vld [vmem:[%s1040_s1] sm:$0xff]  ;;  %v59_v6 = vld [vmem:[%s1041_s2 + $0x38] sm:$0xff]  ;;  %v57_v7 = vld [vmem:[%s1041_s2 + $0x28] sm:$0xff] }
   0x3   :  { %676 = vmatpush3.xpose.msk.msra.mxu0 %vm100_vm0, %v43_v0  ;;  %707 = vmatprep.mubr.msk.f32.mxu0 %vm100_vm0, %v44_v4  ;;  %v40_v5 = vld [vmem:[%s1039_s0 + $0x60] sm:$0xff]  ;;  %v58_v8 = vld [vmem:[%s1041_s2 + $0x30] sm:$0xff]  ;;  %v39_v10 = vld [vmem:[%s1039_s0 + $0x58] sm:$0xff] }
   0x4   :  { %677 = vmatprep.subr.msk.mxu0 %vm100_vm0, %v42_v1  ;;  %97 = vperm.xlu0 %749, %v59_v6   ;;  %v56_v9 = vld [vmem:[%s1041_s2 + $0x20] sm:$0xff]  ;;  %v55_v11 = vld [vmem:[%s1041_s2 + $0x18] sm:$0xff]  ;;  %v54_v12 = vld [vmem:[%s1041_s2 + $0x10] sm:$0xff] }
   0x5   :  { %87 = vperm.xlu1 %750, %v57_v7   ;;  %v38_v13 = vld [vmem:[%s1039_s0 + $0x50] sm:$0xff] }
   0x7   :  { %678 = vmatpush3.xpose.msk.msra.mxu0 %vm100_vm0, %v42_v1 }
   0x8   :  { %679 = vmatprep.subr.msk.mxu0 %vm100_vm0, %v41_v3  ;;  %92 = vperm.xlu0 %749, %v58_v8  }
   0x9   :  { %82 = vperm.xlu1 %750, %v56_v9  }
   0xb   :  { %680 = vmatpush3.xpose.msk.msra.mxu0 %vm100_vm0, %v41_v3 }
   0xc   :  { %681 = vmatprep.subr.msk.mxu0 %vm100_vm0, %v40_v5 }
   0xf   :  { %682 = vmatpush3.xpose.msk.msra.mxu0 %vm100_vm0, %v40_v5 }
  0x10   :  { %683 = vmatprep.subr.msk.mxu0 %vm100_vm0, %v39_v10 }
  0x11   :  { %13 = vsyncpa [#allocation4], 0  ;;  %77 = vperm.xlu0 %749, %v55_v11   ;;  %72 = vperm.xlu1 %750, %v54_v12   ;;  %v53_v14 = vld [vmem:[%s1041_s2 + $0x8] sm:$0xff]  ;;  %v52_v15 = vld [vmem:[%s1041_s2] sm:$0xff]  ;;  %vm358_vm1 = vcmask 523264   ;;  %s776_s13 = smov [#allocation3]  }
  0x12   :  { %v37_v16 = vld [vmem:[%s1039_s0 + $0x48] sm:$0xff]  ;;  %v310_v17 = vld [vmem:[%s1043_s4] sm:$0xff]  ;;  %v312_v20 = vld [vmem:[%s1043_s4 + $0x10] sm:$0xff]  ;;  %s595_s2 = sshll.u32 %s776_s13, 4  ;;  %s596_s2 = int_to_ptr.vmem [resolvable:$true] %s595_s2 }
  0x13   :  { %684 = vmatpush3.xpose.msk.msra.mxu0 %vm100_vm0, %v39_v10  ;;  %v311_v18 = vld [vmem:[%s1043_s4 + $0x8] sm:$0xff]  ;;  %v36_v19 = vld [vmem:[%s1039_s0 + $0x40] sm:$0xff]  ;;  %v313_v21 = vld [vmem:[%s1043_s4 + $0x18] sm:$0xff]  ;;  %s757_s14 = scalar_lea.vmem %s596_s2, 32  ;;  %p758_p1 = scmp.lt.s32.totalorder %s596_s2, %s596_s2 }
  0x14   :  { %685 = vmatprep.subr.msk.mxu0 %vm100_vm0, %v38_v13  ;;  %v35_v22 = vld [vmem:[%s1039_s0 + $0x38] sm:$0xff]  ;;  %v512_v23 = vld [vmem:[%s1044_s5] sm:$0xff]  ;;  %v513_v24 = vld [vmem:[%s1044_s5 + $0x8] sm:$0xff] }
  0x15   :  { %67 = vperm.xlu0 %749, %v53_v14   ;;  %62 = vperm.xlu1 %750, %v52_v15   ;;  %v34_v25 = vld [vmem:[%s1039_s0 + $0x30] sm:$0xff]  ;;  %v314_v26 = vld [vmem:[%s1043_s4 + $0x20] sm:$0xff]  ;;  %v33_v28 = vld [vmem:[%s1039_s0 + $0x28] sm:$0xff] }
  0x16   :  { %v514_v27 = vld [vmem:[%s1044_s5 + $0x10] sm:$0xff]  ;;  %v315_v29 = vld [vmem:[%s1043_s4 + $0x28] sm:$0xff]  ;;  %v515_v30 = vld [vmem:[%s1044_s5 + $0x18] sm:$0xff] }
  0x17   :  { %686 = vmatpush3.xpose.msk.msra.mxu0 %vm100_vm0, %v38_v13  ;;  %v32_v31 = vld [vmem:[%s1039_s0 + $0x20] sm:$0xff]  ;;  %v316_v32 = vld [vmem:[%s1043_s4 + $0x30] sm:$0xff]  ;;  %v31_v34 = vld [vmem:[%s1039_s0 + $0x18] sm:$0xff] }
  0x18   :  { %687 = vmatprep.subr.msk.mxu0 %vm100_vm0, %v37_v16  ;;  %v516_v33 = vld [vmem:[%s1044_s5 + $0x20] sm:$0xff]  ;;  %v317_v35 = vld [vmem:[%s1043_s4 + $0x38] sm:$0xff]  ;;  %v517_v36 = vld [vmem:[%s1044_s5 + $0x28] sm:$0xff] }
  0x19   :  { %320 = vperm.xlu0 %749, %v310_v17   ;;  %325 = vperm.xlu1 %750, %v311_v18   ;;  %v30_v37 = vld [vmem:[%s1039_s0 + $0x10] sm:$0xff]  ;;  %v519_v39 = vld [vmem:[%s1044_s5 + $0x38] sm:$0xff]  ;;  %v29_v40 = vld [vmem:[%s1039_s0 + $0x8] sm:$0xff] }
  0x1a   :  { %v518_v38 = vld [vmem:[%s1044_s5 + $0x30] sm:$0xff]  ;;  %v28_v41 = vld [vmem:[%s1039_s0] sm:$0xff]  ;;  %v45_v42 = vld [vmem:[%s1040_s1 + $0x8] sm:$0xff]  ;;  %s753_s0 = scalar_lea.vmem %s596_s2, 16 }
  0x1b   :  { %688 = vmatpush3.xpose.msk.msra.mxu0 %vm100_vm0, %v37_v16  ;;  %v46_v43 = vld [vmem:[%s1040_s1 + $0x10] sm:$0xff]  ;;  %v47_v44 = vld [vmem:[%s1040_s1 + $0x18] sm:$0xff]  ;;  %v48_v45 = vld [vmem:[%s1040_s1 + $0x20] sm:$0xff]  ;;  %p754_p0 = scmp.ne.s32.totalorder %s596_s2, %s753_s0  ;;  %p759_p2 = scmp.lt.s32.totalorder %s757_s14, %s753_s0 }
  0x1c   :  { %689 = vmatprep.subr.msk.mxu0 %vm100_vm0, %v36_v19  ;;  %v49_v46 = vld [vmem:[%s1040_s1 + $0x28] sm:$0xff]  ;;  %v50_v47 = vld [vmem:[%s1040_s1 + $0x30] sm:$0xff]  ;;  %v51_v48 = vld [vmem:[%s1040_s1 + $0x38] sm:$0xff] }
  0x1d   :  { %330 = vperm.xlu0 %749, %v312_v20   ;;  %335 = vperm.xlu1 %750, %v313_v21   ;;  %v302_v49 = vld [vmem:[%s1042_s3] sm:$0xff]  ;;  %p760_p3 = por %p759_p2, %p758_p1 }
  0x1e   :  { %735 = vmatprep.mubr.msk.f32.mxu1 %vm358_vm1, %v302_v49 }
  0x1f   :  { %690 = vmatpush3.xpose.msk.msra.mxu0 %vm100_vm0, %v36_v19  ;;  %p761_p4 = pnand %p760_p3, %p754_p0 }
  0x20   :  { %691 = vmatprep.subr.msk.mxu0 %vm100_vm0, %v35_v22 }
  0x21   :  { %522 = vperm.xlu0 %749, %v512_v23   ;;  %527 = vperm.xlu1 %750, %v513_v24  }
  0x23   :  { %692 = vmatpush3.xpose.msk.msra.mxu0 %vm100_vm0, %v35_v22 }
  0x24   :  { %693 = vmatprep.subr.msk.mxu0 %vm100_vm0, %v34_v25 }
  0x25   :  { %340 = vperm.xlu0 %749, %v314_v26   ;;  %532 = vperm.xlu1 %750, %v514_v27   ;;  %v303_v26 = vld [vmem:[%s1042_s3 + $0x8] sm:$0xff]  ;;  %v304_v27 = vld [vmem:[%s1042_s3 + $0x10] sm:$0xff] }
  0x27   :  { %694 = vmatpush3.xpose.msk.msra.mxu0 %vm100_vm0, %v34_v25 }
  0x28   :  { %695 = vmatprep.subr.msk.mxu0 %vm100_vm0, %v33_v28 }
  0x29   :  { %345 = vperm.xlu0 %749, %v315_v29   ;;  %537 = vperm.xlu1 %750, %v515_v30   ;;  %v306_v29 = vld [vmem:[%s1042_s3 + $0x20] sm:$0xff]  ;;  %v307_v30 = vld [vmem:[%s1042_s3 + $0x28] sm:$0xff] }
  0x2b   :  { %696 = vmatpush3.xpose.msk.msra.mxu0 %vm100_vm0, %v33_v28  ;;  %v305_v28 = vld [vmem:[%s1042_s3 + $0x18] sm:$0xff] }
  0x2c   :  { %697 = vmatprep.subr.msk.mxu0 %vm100_vm0, %v32_v31 }
  0x2d   :  { %350 = vperm.xlu0 %749, %v316_v32   ;;  %542 = vperm.xlu1 %750, %v516_v33   ;;  %v309_v32 = vld [vmem:[%s1042_s3 + $0x38] sm:$0xff] }
  0x2f   :  { %698 = vmatpush3.xpose.msk.msra.mxu0 %vm100_vm0, %v32_v31  ;;  %v308_v31 = vld [vmem:[%s1042_s3 + $0x30] sm:$0xff] }
  0x30   :  { %699 = vmatprep.subr.msk.mxu0 %vm100_vm0, %v31_v34 }
  0x31   :  { %355 = vperm.xlu0 %749, %v317_v35   ;;  %547 = vperm.xlu1 %750, %v517_v36  }
  0x33   :  { %700 = vmatpush3.xpose.msk.msra.mxu0 %vm100_vm0, %v31_v34 }
  0x34   :  { %701 = vmatprep.subr.msk.mxu0 %vm100_vm0, %v30_v37 }
  0x35   :  { %552 = vperm.xlu0 %749, %v518_v38   ;;  %557 = vperm.xlu1 %750, %v519_v39  }
  0x37   :  { %702 = vmatpush3.xpose.msk.msra.mxu0 %vm100_vm0, %v30_v37 }
  0x38   :  { %703 = vmatprep.subr.msk.mxu0 %vm100_vm0, %v29_v40 }
  0x3b   :  { %704 = vmatpush3.xpose.msk.msra.mxu0 %vm100_vm0, %v29_v40 }
  0x3c   :  { %705 = vmatprep.subr.msk.mxu0 %vm100_vm0, %v28_v41 }
  0x3f   :  { %706 = vmatpush3.xpose.msk.msra.mxu0 %vm100_vm0, %v28_v41 }
  0x42   :  { %708 = vmatmul.mubr.msk.f32.vlgmr.msra.gmra.mxu0 %vm100_vm0, %v45_v42 }
  0x43   :  { %710 = vmatprep.mubr.msk.f32.mxu0 %vm100_vm0, %v46_v43 }
  0x46   :  { %711 = vmatmul.mubr.msk.f32.gmra.mxu0 %vm100_vm0, %v47_v44 }
  0x47   :  { %713 = vmatprep.mubr.msk.f32.mxu0 %vm100_vm0, %v48_v45 }
  0x4a   :  { %714 = vmatmul.mubr.msk.f32.gmra.mxu0 %vm100_vm0, %v49_v46 }
  0x4b   :  { %716 = vmatprep.mubr.msk.f32.mxu0 %vm100_vm0, %v50_v47 }
  0x4e   :  { %717 = vmatmul.mubr.msk.f32.gmra.mxu0 %vm100_vm0, %v51_v48 }
  0x7f   :  { %v98_v51 = vpop.permute.xlu0 %97 }
  0x80   :  { %v88_v53 = vpop.permute.xlu1 %87 }
  0x83   :  { %v93_v56 = vpop.permute.xlu0 %92 }
  0x84   :  { %v83_v58 = vpop.permute.xlu1 %82 }
  0x8c   :  { %v78_v63 = vpop.permute.xlu0 %77  ;;  %v73_v4 = vpop.permute.xlu1 %72 }
  0x90   :  { %v68_v12 = vpop.permute.xlu0 %67  ;;  %v63_v16 = vpop.permute.xlu1 %62 }
  0x94   :  { %v321_v33 = vpop.permute.xlu0 %320  ;;  %v326_v34 = vpop.permute.xlu1 %325 }
  0x98   :  { %v331_v35 = vpop.permute.xlu0 %330  ;;  %v336_v36 = vpop.permute.xlu1 %335 }
  0x9c   :  { %v523_v37 = vpop.permute.xlu0 %522  ;;  %v528_v38 = vpop.permute.xlu1 %527 }
  0xa0   :  { %v341_v39 = vpop.permute.xlu0 %340  ;;  %v533_v40 = vpop.permute.xlu1 %532 }
  0xa4   :  { %v346_v41 = vpop.permute.xlu0 %345  ;;  %v538_v45 = vpop.permute.xlu1 %537 }
 0x102   :  { %v709_v50 = vpop.f32.mrf.mxu0 }
 0x103   :  { %v245_v13 = vadd.f32 %v709_v50, %v68_v12 }
 0x104   :  { %v239_v52 = vpop.f32.mrf.mxu0 }
 0x105   :  { %v240_v17 = vadd.f32 %v239_v52, %v63_v16  ;;  %v287_v20 = vmul.f32 0.2, %v245_v13  ;;  %vm279_vm8 = vcmp.gt.f32.partialorder %v245_v13, 0.0 }
 0x106   :  { %v712_v54 = vpop.f32.mrf.mxu0 }
 0x107   :  { %v255_v5 = vadd.f32 %v712_v54, %v78_v63  ;;  %v286_v22 = vmul.f32 0.2, %v240_v17  ;;  %vm278_vm9 = vcmp.gt.f32.partialorder %v240_v17, 0.0  ;;  %v295_v24 = vsel %vm279_vm8, %v245_v13, %v287_v20 }
 0x108   :  { %v249_v55 = vpop.f32.mrf.mxu0 }
 0x109   :  { %v250_v9 = vadd.f32 %v249_v55, %v73_v4  ;;  %v289_v14 = vmul.f32 0.2, %v255_v5  ;;  %vm281_vm6 = vcmp.gt.f32.partialorder %v255_v5, 0.0  ;;  %v294_v25 = vsel %vm278_vm9, %v240_v17, %v286_v22 }
 0x10a   :  { %v715_v57 = vpop.f32.mrf.mxu0 }
 0x10b   :  { %v265_v61 = vadd.f32 %v715_v57, %v88_v53  ;;  %v288_v18 = vmul.f32 0.2, %v250_v9  ;;  %vm280_vm7 = vcmp.gt.f32.partialorder %v250_v9, 0.0  ;;  %v297_v21 = vsel %vm281_vm6, %v255_v5, %v289_v14 }
 0x10c   :  { %v259_v59 = vpop.f32.mrf.mxu0 }
 0x10d   :  { %v260_v1 = vadd.f32 %v259_v59, %v83_v58  ;;  %v291_v6 = vmul.f32 0.2, %v265_v61  ;;  %vm283_vm4 = vcmp.gt.f32.partialorder %v265_v61, 0.0  ;;  %v296_v23 = vsel %vm280_vm7, %v250_v9, %v288_v18  ;;  %v543_v59 = vpop.permute.xlu1 %542 }
 0x10e   :  { %v718_v60 = vpop.f32.mrf.mxu0 }
 0x10f   :  { %v275_v62 = vadd.f32 %v718_v60, %v98_v51  ;;  %v290_v10 = vmul.f32 0.2, %v260_v1  ;;  %vm282_vm5 = vcmp.gt.f32.partialorder %v260_v1, 0.0  ;;  %v299_v15 = vsel %vm283_vm4, %v265_v61, %v291_v6  ;;  %v351_v51 = vpop.permute.xlu0 %350 }
 0x110   :  { %v269_v0 = vpop.f32.mrf.mxu0 }
 0x111   :  { %v270_v2 = vadd.f32 %v269_v0, %v93_v56  ;;  %vm285_vm2 = vcmp.gt.f32.partialorder %v275_v62, 0.0  ;;  %v293_v3 = vmul.f32 0.2, %v275_v62  ;;  %v298_v19 = vsel %vm282_vm5, %v260_v1, %v290_v10  ;;  %v548_v13 = vpop.permute.xlu1 %547 }
 0x113   :  { %v292_v7 = vmul.f32 0.2, %v270_v2  ;;  %v301_v8 = vsel %vm285_vm2, %v275_v62, %v293_v3  ;;  %vm284_vm3 = vcmp.gt.f32.partialorder %v270_v2, 0.0  ;;  %v356_v4 = vpop.permute.xlu0 %355 }
 0x114   :  { %719 = vmatprep.subr.mxu1 %v301_v8 }
 0x115   :  { %720 = vmatpush3.msra.mxu1 %v301_v8  ;;  %v300_v11 = vsel %vm284_vm3, %v270_v2, %v292_v7 }
 0x116   :  { %721 = vmatprep.subr.mxu1 %v300_v11 }
 0x117   :  { %722 = vmatpush3.msra.mxu1 %v300_v11 }
 0x118   :  { %723 = vmatprep.subr.mxu1 %v299_v15 }
 0x119   :  { %724 = vmatpush3.msra.mxu1 %v299_v15 }
 0x11a   :  { %725 = vmatprep.subr.mxu1 %v298_v19 }
 0x11b   :  { %726 = vmatpush3.msra.mxu1 %v298_v19 }
 0x11c   :  { %727 = vmatprep.subr.mxu1 %v297_v21 }
 0x11d   :  { %728 = vmatpush3.msra.mxu1 %v297_v21 }
 0x11e   :  { %729 = vmatprep.subr.mxu1 %v296_v23 }
 0x11f   :  { %730 = vmatpush3.msra.mxu1 %v296_v23  ;;  %v553_v23 = vpop.permute.xlu0 %552 }
 0x120   :  { %731 = vmatprep.subr.mxu1 %v295_v24 }
 0x121   :  { %732 = vmatpush3.msra.mxu1 %v295_v24 }
 0x122   :  { %733 = vmatprep.subr.mxu1 %v294_v25 }
 0x123   :  { %734 = vmatpush3.msra.mxu1 %v294_v25 }
 0x124   :  { %736 = vmatmul.mubr.msk.f32.vlgmr.msra.gmra.mxu1 %vm358_vm1, %v303_v26 }
 0x125   :  { %738 = vmatprep.mubr.msk.f32.mxu1 %vm358_vm1, %v304_v27 }
 0x128   :  { %739 = vmatmul.mubr.msk.f32.gmra.mxu1 %vm358_vm1, %v305_v28  ;;  %v558_v28 = vpop.permute.xlu1 %557 }
 0x129   :  { %741 = vmatprep.mubr.msk.f32.mxu1 %vm358_vm1, %v306_v29 }
 0x12c   :  { %742 = vmatmul.mubr.msk.f32.gmra.mxu1 %vm358_vm1, %v307_v30 }
 0x12d   :  { %744 = vmatprep.mubr.msk.f32.mxu1 %vm358_vm1, %v308_v31 }
 0x130   :  { %745 = vmatmul.mubr.msk.f32.gmra.mxu1 %vm358_vm1, %v309_v32 }
 0x1e4   :  { %v737_v42 = vpop.f32.mrf.mxu1 }
 0x1e5   :  { %v455_v43 = vadd.f32 %v737_v42, %v326_v34 }
 0x1e6   :  { %v449_v44 = vpop.f32.mrf.mxu1 }
 0x1e7   :  { %v497_v46 = vmul.f32 0.2, %v455_v43  ;;  %v450_v47 = vadd.f32 %v449_v44, %v321_v33  ;;  %vm489_vm10 = vcmp.gt.f32.partialorder %v455_v43, 0.0 }
 0x1e8   :  { %v740_v48 = vpop.f32.mrf.mxu1 }
 0x1e9   :  { %vm488_vm11 = vcmp.gt.f32.partialorder %v450_v47, 0.0  ;;  %v496_v49 = vmul.f32 0.2, %v450_v47  ;;  %v465_v50 = vadd.f32 %v740_v48, %v336_v36  ;;  %v505_v53 = vsel %vm489_vm10, %v455_v43, %v497_v46 }
 0x1ea   :  { %v459_v52 = vpop.f32.mrf.mxu1  ;;  %v561_v62 = vmul.f32 %v528_v38, %v505_v53 }
 0x1eb   :  { %v504_v54 = vsel %vm488_vm11, %v450_v47, %v496_v49  ;;  %v499_v55 = vmul.f32 0.2, %v465_v50  ;;  %v460_v56 = vadd.f32 %v459_v52, %v331_v35  ;;  %vm491_vm12 = vcmp.gt.f32.partialorder %v465_v50, 0.0 }
 0x1ec   :  { %v560_v57 = vmul.f32 %v523_v37, %v504_v54  ;;  %v743_v58 = vpop.f32.mrf.mxu1  ;;  %v582_v37 = vstv %s1045_s6 }
 0x1ed   :  { %vm490_vm13 = vcmp.gt.f32.partialorder %v460_v56, 0.0  ;;  %v498_v60 = vmul.f32 0.2, %v460_v56  ;;  %v475_v61 = vadd.f32 %v743_v58, %v346_v41  ;;  %v507_v0 = vsel %vm491_vm12, %v465_v50, %v499_v55 }
 0x1ee   :  { %v469_v63 = vpop.f32.mrf.mxu1  ;;  %v568_v5 = vadd.f32 %v561_v62, %v560_v57  ;;  %v563_v10 = vmul.f32 %v538_v45, %v507_v0 }
 0x1ef   :  { %v506_v1 = vsel %vm490_vm13, %v460_v56, %v498_v60  ;;  %v501_v2 = vmul.f32 0.2, %v475_v61  ;;  %v470_v3 = vadd.f32 %v469_v63, %v341_v39  ;;  %vm493_vm14 = vcmp.gt.f32.partialorder %v475_v61, 0.0 }
 0x1f0   :  { %v562_v6 = vmul.f32 %v533_v40, %v506_v1  ;;  %v746_v7 = vpop.f32.mrf.mxu1 }
 0x1f1   :  { %vm492_vm15 = vcmp.gt.f32.partialorder %v470_v3, 0.0  ;;  %v500_v8 = vmul.f32 0.2, %v470_v3  ;;  %v485_v9 = vadd.f32 %v746_v7, %v356_v4  ;;  %v509_v14 = vsel %vm493_vm14, %v475_v61, %v501_v2 }
 0x1f2   :  { %v569_v11 = vadd.f32 %v568_v5, %v562_v6  ;;  %v479_v12 = vpop.f32.mrf.mxu1  ;;  %v565_v21 = vmul.f32 %v548_v13, %v509_v14 }
 0x1f3   :  { %v508_v15 = vsel %vm492_vm15, %v470_v3, %v500_v8  ;;  %v503_v16 = vmul.f32 0.2, %v485_v9  ;;  %v480_v17 = vadd.f32 %v479_v12, %v351_v51  ;;  %vm495_vm0 = vcmp.gt.f32.partialorder %v485_v9, 0.0 }
 0x1f4   :  { %v564_v18 = vmul.f32 %v543_v59, %v508_v15  ;;  %v570_v19 = vadd.f32 %v569_v11, %v563_v10 }
 0x1f5   :  { %vm494_vm1 = vcmp.gt.f32.partialorder %v480_v17, 0.0  ;;  %v502_v20 = vmul.f32 0.2, %v480_v17  ;;  %v511_v24 = vsel %vm495_vm0, %v485_v9, %v503_v16 }
 0x1f6   :  { %v571_v22 = vadd.f32 %v570_v19, %v564_v18  ;;  %v567_v29 = vmul.f32 %v558_v28, %v511_v24 }
 0x1f7   :  { %v510_v25 = vsel %vm494_vm1, %v480_v17, %v502_v20 }
 0x1f8   :  { %v566_v26 = vmul.f32 %v553_v23, %v510_v25  ;;  %v572_v27 = vadd.f32 %v571_v22, %v565_v21 }
 0x1fa   :  { %v573_v30 = vadd.f32 %v572_v27, %v566_v26 }
 0x1fc   :  { %v574_v31 = vadd.f32 %v573_v30, %v567_v29 }
 0x1fe   :  { %v575_v32 = vrot.slane %v574_v31, 4 }
 0x200   :  { %v576_v33 = vadd.f32 %v575_v32, %v574_v31 }
 0x202   :  { %v577_v34 = vrot.slane %v576_v33, 2 }
 0x204   :  { %v578_v35 = vadd.f32 %v577_v34, %v576_v33 }
 0x206   :  { %v579_v36 = vrot.slane %v578_v35, 1 }
 0x208   :  { %v580_v38 = vadd.f32 %v579_v36, %v578_v35 }
 0x20a   :  { %v583_v39 = vadd.f32 %v582_v37, %v580_v38 }
 0x20c   :  { %v584_v40 = vmul.f32 0.5, %v583_v39 }
 0x20e   :  { %751 = vtanh.f32 %v584_v40 }
 0x21b   :  { %v752_v41 = vpop.eup %751 }
 0x21c   :  { %v586_v42 = vadd.f32 1.0, %v752_v41 }
 0x21e   :  { %v587_v43 = vmul.f32 0.5, %v586_v42 }
 0x220   :  { %588 = vst [vmem:[#allocation3] sm:$0x1] %v587_v43 }
 0x221   :  { %764 = shalt.err (!%p761_p4)
}
 0x222   :  { %598 = dma.vmem_to_hbm [thread:$0]  %s596_s2, 16, %s1046_s7, [#allocation4]  }
 0x223   :  { %773 = dma.done.wait [#allocation4], 16  }
 0x224   :  { %774 = vsyncadd [#allocation4], 4294967280 }
 0x225   :  { %602 = vsyncpa [#allocation4], 1 }

// kernel: tpu_custom_call.1
= control target key start
LH: loop header
LB: loop body
LE: loop exit
PB: predicated region body
PF: predicated region fallthrough
CT: control target
= control target key end

     0   :  { %vm100_vm0 = vcmask 261120   ;;  %v775_v2 = vmov 0   ;;  %s1039_s0 = inlined_call_operand.vmem [shape: f32[10,32], index: 0, kind: input, shape index: {}]   ;;  %s1040_s1 = inlined_call_operand.vmem [shape: f32[64,32], index: 1, kind: input, shape index: {}]   ;;  %s1041_s2 = inlined_call_operand.vmem [shape: f32[64,1], index: 2, kind: input, shape index: {}]   ;;  %s1042_s3 = inlined_call_operand.vmem [shape: f32[64,64], index: 3, kind: input, shape index: {}]   ;;  %s1043_s4 = inlined_call_operand.vmem [shape: f32[64,1], index: 4, kind: input, shape index: {}]   ;;  %s1044_s5 = inlined_call_operand.vmem [shape: f32[64,1], index: 5, kind: input, shape index: {}]   ;;  %s1045_s6 = inlined_call_operand.<no memory space> [shape: f32[1], index: 6, kind: input, shape index: {}]   ;;  %s1046_s7 = inlined_call_operand.hbm [shape: f32[1,10], index: 7, kind: output, shape index: {}]  }
   0x1   :  { %v43_v0 = vld [vmem:[%s1039_s0 + $0x78] sm:$0xff]  ;;  %v42_v1 = vld [vmem:[%s1039_s0 + $0x70] sm:$0xff]  ;;  %749 = vset.pattern.permute.xlu0 %v775_v2  ;;  %750 = vset.pattern.permute.xlu1 %v775_v2  ;;  %v41_v3 = vld [vmem:[%s1039_s0 + $0x68] sm:$0xff] }
   0x2   :  { %675 = vmatprep.subr.msk.mxu0 %vm100_vm0, %v43_v0  ;;  %v44_v4 = vld [vmem:[%s1040_s1] sm:$0xff]  ;;  %v59_v6 = vld [vmem:[%s1041_s2 + $0x38] sm:$0xff]  ;;  %v57_v7 = vld [vmem:[%s1041_s2 + $0x28] sm:$0xff] }
   0x3   :  { %676 = vmatpush3.xpose.msk.msra.mxu0 %vm100_vm0, %v43_v0  ;;  %707 = vmatprep.mubr.msk.f32.mxu0 %vm100_vm0, %v44_v4  ;;  %v40_v5 = vld [vmem:[%s1039_s0 + $0x60] sm:$0xff]  ;;  %v58_v8 = vld [vmem:[%s1041_s2 + $0x30] sm:$0xff]  ;;  %v39_v10 = vld [vmem:[%s1039_s0 + $0x58] sm:$0xff] }
   0x4   :  { %677 = vmatprep.subr.msk.mxu0 %vm100_vm0, %v42_v1  ;;  %97 = vperm.xlu0 %749, %v59_v6   ;;  %v56_v9 = vld [vmem:[%s1041_s2 + $0x20] sm:$0xff]  ;;  %v55_v11 = vld [vmem:[%s1041_s2 + $0x18] sm:$0xff]  ;;  %v54_v12 = vld [vmem:[%s1041_s2 + $0x10] sm:$0xff] }
   0x5   :  { %87 = vperm.xlu1 %750, %v57_v7   ;;  %v38_v13 = vld [vmem:[%s1039_s0 + $0x50] sm:$0xff] }
   0x7   :  { %678 = vmatpush3.xpose.msk.msra.mxu0 %vm100_vm0, %v42_v1 }
   0x8   :  { %679 = vmatprep.subr.msk.mxu0 %vm100_vm0, %v41_v3  ;;  %92 = vperm.xlu0 %749, %v58_v8  }
   0x9   :  { %82 = vperm.xlu1 %750, %v56_v9  }
   0xb   :  { %680 = vmatpush3.xpose.msk.msra.mxu0 %vm100_vm0, %v41_v3 }
   0xc   :  { %681 = vmatprep.subr.msk.mxu0 %vm100_vm0, %v40_v5 }
   0xf   :  { %682 = vmatpush3.xpose.msk.msra.mxu0 %vm100_vm0, %v40_v5 }
  0x10   :  { %683 = vmatprep.subr.msk.mxu0 %vm100_vm0, %v39_v10 }
  0x11   :  { %13 = vsyncpa [#allocation4], 0  ;;  %77 = vperm.xlu0 %749, %v55_v11   ;;  %72 = vperm.xlu1 %750, %v54_v12   ;;  %v53_v14 = vld [vmem:[%s1041_s2 + $0x8] sm:$0xff]  ;;  %v52_v15 = vld [vmem:[%s1041_s2] sm:$0xff]  ;;  %vm358_vm1 = vcmask 523264   ;;  %s776_s13 = smov [#allocation3]  }
  0x12   :  { %v37_v16 = vld [vmem:[%s1039_s0 + $0x48] sm:$0xff]  ;;  %v310_v17 = vld [vmem:[%s1043_s4] sm:$0xff]  ;;  %v312_v20 = vld [vmem:[%s1043_s4 + $0x10] sm:$0xff]  ;;  %s595_s2 = sshll.u32 %s776_s13, 4  ;;  %s596_s2 = int_to_ptr.vmem [resolvable:$true] %s595_s2 }
  0x13   :  { %684 = vmatpush3.xpose.msk.msra.mxu0 %vm100_vm0, %v39_v10  ;;  %v311_v18 = vld [vmem:[%s1043_s4 + $0x8] sm:$0xff]  ;;  %v36_v19 = vld [vmem:[%s1039_s0 + $0x40] sm:$0xff]  ;;  %v313_v21 = vld [vmem:[%s1043_s4 + $0x18] sm:$0xff]  ;;  %s757_s14 = scalar_lea.vmem %s596_s2, 32  ;;  %p758_p1 = scmp.lt.s32.totalorder %s596_s2, %s596_s2 }
  0x14   :  { %685 = vmatprep.subr.msk.mxu0 %vm100_vm0, %v38_v13  ;;  %v35_v22 = vld [vmem:[%s1039_s0 + $0x38] sm:$0xff]  ;;  %v512_v23 = vld [vmem:[%s1044_s5] sm:$0xff]  ;;  %v513_v24 = vld [vmem:[%s1044_s5 + $0x8] sm:$0xff] }
  0x15   :  { %67 = vperm.xlu0 %749, %v53_v14   ;;  %62 = vperm.xlu1 %750, %v52_v15   ;;  %v34_v25 = vld [vmem:[%s1039_s0 + $0x30] sm:$0xff]  ;;  %v314_v26 = vld [vmem:[%s1043_s4 + $0x20] sm:$0xff]  ;;  %v33_v28 = vld [vmem:[%s1039_s0 + $0x28] sm:$0xff] }
  0x16   :  { %v514_v27 = vld [vmem:[%s1044_s5 + $0x10] sm:$0xff]  ;;  %v315_v29 = vld [vmem:[%s1043_s4 + $0x28] sm:$0xff]  ;;  %v515_v30 = vld [vmem:[%s1044_s5 + $0x18] sm:$0xff] }
  0x17   :  { %686 = vmatpush3.xpose.msk.msra.mxu0 %vm100_vm0, %v38_v13  ;;  %v32_v31 = vld [vmem:[%s1039_s0 + $0x20] sm:$0xff]  ;;  %v316_v32 = vld [vmem:[%s1043_s4 + $0x30] sm:$0xff]  ;;  %v31_v34 = vld [vmem:[%s1039_s0 + $0x18] sm:$0xff] }
  0x18   :  { %687 = vmatprep.subr.msk.mxu0 %vm100_vm0, %v37_v16  ;;  %v516_v33 = vld [vmem:[%s1044_s5 + $0x20] sm:$0xff]  ;;  %v317_v35 = vld [vmem:[%s1043_s4 + $0x38] sm:$0xff]  ;;  %v517_v36 = vld [vmem:[%s1044_s5 + $0x28] sm:$0xff] }
  0x19   :  { %320 = vperm.xlu0 %749, %v310_v17   ;;  %325 = vperm.xlu1 %750, %v311_v18   ;;  %v30_v37 = vld [vmem:[%s1039_s0 + $0x10] sm:$0xff]  ;;  %v519_v39 = vld [vmem:[%s1044_s5 + $0x38] sm:$0xff]  ;;  %v29_v40 = vld [vmem:[%s1039_s0 + $0x8] sm:$0xff] }
  0x1a   :  { %v518_v38 = vld [vmem:[%s1044_s5 + $0x30] sm:$0xff]  ;;  %v28_v41 = vld [vmem:[%s1039_s0] sm:$0xff]  ;;  %v45_v42 = vld [vmem:[%s1040_s1 + $0x8] sm:$0xff]  ;;  %s753_s0 = scalar_lea.vmem %s596_s2, 16 }
  0x1b   :  { %688 = vmatpush3.xpose.msk.msra.mxu0 %vm100_vm0, %v37_v16  ;;  %v46_v43 = vld [vmem:[%s1040_s1 + $0x10] sm:$0xff]  ;;  %v47_v44 = vld [vmem:[%s1040_s1 + $0x18] sm:$0xff]  ;;  %v48_v45 = vld [vmem:[%s1040_s1 + $0x20] sm:$0xff]  ;;  %p754_p0 = scmp.ne.s32.totalorder %s596_s2, %s753_s0  ;;  %p759_p2 = scmp.lt.s32.totalorder %s757_s14, %s753_s0 }
  0x1c   :  { %689 = vmatprep.subr.msk.mxu0 %vm100_vm0, %v36_v19  ;;  %v49_v46 = vld [vmem:[%s1040_s1 + $0x28] sm:$0xff]  ;;  %v50_v47 = vld [vmem:[%s1040_s1 + $0x30] sm:$0xff]  ;;  %v51_v48 = vld [vmem:[%s1040_s1 + $0x38] sm:$0xff] }
  0x1d   :  { %330 = vperm.xlu0 %749, %v312_v20   ;;  %335 = vperm.xlu1 %750, %v313_v21   ;;  %v302_v49 = vld [vmem:[%s1042_s3] sm:$0xff]  ;;  %p760_p3 = por %p759_p2, %p758_p1 }
  0x1e   :  { %735 = vmatprep.mubr.msk.f32.mxu1 %vm358_vm1, %v302_v49 }
  0x1f   :  { %690 = vmatpush3.xpose.msk.msra.mxu0 %vm100_vm0, %v36_v19  ;;  %p761_p4 = pnand %p760_p3, %p754_p0 }
  0x20   :  { %691 = vmatprep.subr.msk.mxu0 %vm100_vm0, %v35_v22 }
  0x21   :  { %522 = vperm.xlu0 %749, %v512_v23   ;;  %527 = vperm.xlu1 %750, %v513_v24  }
  0x23   :  { %692 = vmatpush3.xpose.msk.msra.mxu0 %vm100_vm0, %v35_v22 }
  0x24   :  { %693 = vmatprep.subr.msk.mxu0 %vm100_vm0, %v34_v25 }
  0x25   :  { %340 = vperm.xlu0 %749, %v314_v26   ;;  %532 = vperm.xlu1 %750, %v514_v27   ;;  %v303_v26 = vld [vmem:[%s1042_s3 + $0x8] sm:$0xff]  ;;  %v304_v27 = vld [vmem:[%s1042_s3 + $0x10] sm:$0xff] }
  0x27   :  { %694 = vmatpush3.xpose.msk.msra.mxu0 %vm100_vm0, %v34_v25 }
  0x28   :  { %695 = vmatprep.subr.msk.mxu0 %vm100_vm0, %v33_v28 }
  0x29   :  { %345 = vperm.xlu0 %749, %v315_v29   ;;  %537 = vperm.xlu1 %750, %v515_v30   ;;  %v306_v29 = vld [vmem:[%s1042_s3 + $0x20] sm:$0xff]  ;;  %v307_v30 = vld [vmem:[%s1042_s3 + $0x28] sm:$0xff] }
  0x2b   :  { %696 = vmatpush3.xpose.msk.msra.mxu0 %vm100_vm0, %v33_v28  ;;  %v305_v28 = vld [vmem:[%s1042_s3 + $0x18] sm:$0xff] }
  0x2c   :  { %697 = vmatprep.subr.msk.mxu0 %vm100_vm0, %v32_v31 }
  0x2d   :  { %350 = vperm.xlu0 %749, %v316_v32   ;;  %542 = vperm.xlu1 %750, %v516_v33   ;;  %v309_v32 = vld [vmem:[%s1042_s3 + $0x38] sm:$0xff] }
  0x2f   :  { %698 = vmatpush3.xpose.msk.msra.mxu0 %vm100_vm0, %v32_v31  ;;  %v308_v31 = vld [vmem:[%s1042_s3 + $0x30] sm:$0xff] }
  0x30   :  { %699 = vmatprep.subr.msk.mxu0 %vm100_vm0, %v31_v34 }
  0x31   :  { %355 = vperm.xlu0 %749, %v317_v35   ;;  %547 = vperm.xlu1 %750, %v517_v36  }
  0x33   :  { %700 = vmatpush3.xpose.msk.msra.mxu0 %vm100_vm0, %v31_v34 }
  0x34   :  { %701 = vmatprep.subr.msk.mxu0 %vm100_vm0, %v30_v37 }
  0x35   :  { %552 = vperm.xlu0 %749, %v518_v38   ;;  %557 = vperm.xlu1 %750, %v519_v39  }
  0x37   :  { %702 = vmatpush3.xpose.msk.msra.mxu0 %vm100_vm0, %v30_v37 }
  0x38   :  { %703 = vmatprep.subr.msk.mxu0 %vm100_vm0, %v29_v40 }
  0x3b   :  { %704 = vmatpush3.xpose.msk.msra.mxu0 %vm100_vm0, %v29_v40 }
  0x3c   :  { %705 = vmatprep.subr.msk.mxu0 %vm100_vm0, %v28_v41 }
  0x3f   :  { %706 = vmatpush3.xpose.msk.msra.mxu0 %vm100_vm0, %v28_v41 }
  0x42   :  { %708 = vmatmul.mubr.msk.f32.vlgmr.msra.gmra.mxu0 %vm100_vm0, %v45_v42 }
  0x43   :  { %710 = vmatprep.mubr.msk.f32.mxu0 %vm100_vm0, %v46_v43 }
  0x46   :  { %711 = vmatmul.mubr.msk.f32.gmra.mxu0 %vm100_vm0, %v47_v44 }
  0x47   :  { %713 = vmatprep.mubr.msk.f32.mxu0 %vm100_vm0, %v48_v45 }
  0x4a   :  { %714 = vmatmul.mubr.msk.f32.gmra.mxu0 %vm100_vm0, %v49_v46 }
  0x4b   :  { %716 = vmatprep.mubr.msk.f32.mxu0 %vm100_vm0, %v50_v47 }
  0x4e   :  { %717 = vmatmul.mubr.msk.f32.gmra.mxu0 %vm100_vm0, %v51_v48 }
  0x7f   :  { %v98_v51 = vpop.permute.xlu0 %97 }
  0x80   :  { %v88_v53 = vpop.permute.xlu1 %87 }
  0x83   :  { %v93_v56 = vpop.permute.xlu0 %92 }
  0x84   :  { %v83_v58 = vpop.permute.xlu1 %82 }
  0x8c   :  { %v78_v63 = vpop.permute.xlu0 %77  ;;  %v73_v4 = vpop.permute.xlu1 %72 }
  0x90   :  { %v68_v12 = vpop.permute.xlu0 %67  ;;  %v63_v16 = vpop.permute.xlu1 %62 }
  0x94   :  { %v321_v33 = vpop.permute.xlu0 %320  ;;  %v326_v34 = vpop.permute.xlu1 %325 }
  0x98   :  { %v331_v35 = vpop.permute.xlu0 %330  ;;  %v336_v36 = vpop.permute.xlu1 %335 }
  0x9c   :  { %v523_v37 = vpop.permute.xlu0 %522  ;;  %v528_v38 = vpop.permute.xlu1 %527 }
  0xa0   :  { %v341_v39 = vpop.permute.xlu0 %340  ;;  %v533_v40 = vpop.permute.xlu1 %532 }
  0xa4   :  { %v346_v41 = vpop.permute.xlu0 %345  ;;  %v538_v45 = vpop.permute.xlu1 %537 }
 0x102   :  { %v709_v50 = vpop.f32.mrf.mxu0 }
 0x103   :  { %v245_v13 = vadd.f32 %v709_v50, %v68_v12 }
 0x104   :  { %v239_v52 = vpop.f32.mrf.mxu0 }
 0x105   :  { %v240_v17 = vadd.f32 %v239_v52, %v63_v16  ;;  %v287_v20 = vmul.f32 0.2, %v245_v13  ;;  %vm279_vm8 = vcmp.gt.f32.partialorder %v245_v13, 0.0 }
 0x106   :  { %v712_v54 = vpop.f32.mrf.mxu0 }
 0x107   :  { %v255_v5 = vadd.f32 %v712_v54, %v78_v63  ;;  %v286_v22 = vmul.f32 0.2, %v240_v17  ;;  %vm278_vm9 = vcmp.gt.f32.partialorder %v240_v17, 0.0  ;;  %v295_v24 = vsel %vm279_vm8, %v245_v13, %v287_v20 }
 0x108   :  { %v249_v55 = vpop.f32.mrf.mxu0 }
 0x109   :  { %v250_v9 = vadd.f32 %v249_v55, %v73_v4  ;;  %v289_v14 = vmul.f32 0.2, %v255_v5  ;;  %vm281_vm6 = vcmp.gt.f32.partialorder %v255_v5, 0.0  ;;  %v294_v25 = vsel %vm278_vm9, %v240_v17, %v286_v22 }
 0x10a   :  { %v715_v57 = vpop.f32.mrf.mxu0 }
 0x10b   :  { %v265_v61 = vadd.f32 %v715_v57, %v88_v53  ;;  %v288_v18 = vmul.f32 0.2, %v250_v9  ;;  %vm280_vm7 = vcmp.gt.f32.partialorder %v250_v9, 0.0  ;;  %v297_v21 = vsel %vm281_vm6, %v255_v5, %v289_v14 }
 0x10c   :  { %v259_v59 = vpop.f32.mrf.mxu0 }
 0x10d   :  { %v260_v1 = vadd.f32 %v259_v59, %v83_v58  ;;  %v291_v6 = vmul.f32 0.2, %v265_v61  ;;  %vm283_vm4 = vcmp.gt.f32.partialorder %v265_v61, 0.0  ;;  %v296_v23 = vsel %vm280_vm7, %v250_v9, %v288_v18  ;;  %v543_v59 = vpop.permute.xlu1 %542 }
 0x10e   :  { %v718_v60 = vpop.f32.mrf.mxu0 }
 0x10f   :  { %v275_v62 = vadd.f32 %v718_v60, %v98_v51  ;;  %v290_v10 = vmul.f32 0.2, %v260_v1  ;;  %vm282_vm5 = vcmp.gt.f32.partialorder %v260_v1, 0.0  ;;  %v299_v15 = vsel %vm283_vm4, %v265_v61, %v291_v6  ;;  %v351_v51 = vpop.permute.xlu0 %350 }
 0x110   :  { %v269_v0 = vpop.f32.mrf.mxu0 }
 0x111   :  { %v270_v2 = vadd.f32 %v269_v0, %v93_v56  ;;  %vm285_vm2 = vcmp.gt.f32.partialorder %v275_v62, 0.0  ;;  %v293_v3 = vmul.f32 0.2, %v275_v62  ;;  %v298_v19 = vsel %vm282_vm5, %v260_v1, %v290_v10  ;;  %v548_v13 = vpop.permute.xlu1 %547 }
 0x113   :  { %v292_v7 = vmul.f32 0.2, %v270_v2  ;;  %v301_v8 = vsel %vm285_vm2, %v275_v62, %v293_v3  ;;  %vm284_vm3 = vcmp.gt.f32.partialorder %v270_v2, 0.0  ;;  %v356_v4 = vpop.permute.xlu0 %355 }
 0x114   :  { %719 = vmatprep.subr.mxu1 %v301_v8 }
 0x115   :  { %720 = vmatpush3.msra.mxu1 %v301_v8  ;;  %v300_v11 = vsel %vm284_vm3, %v270_v2, %v292_v7 }
 0x116   :  { %721 = vmatprep.subr.mxu1 %v300_v11 }
 0x117   :  { %722 = vmatpush3.msra.mxu1 %v300_v11 }
 0x118   :  { %723 = vmatprep.subr.mxu1 %v299_v15 }
 0x119   :  { %724 = vmatpush3.msra.mxu1 %v299_v15 }
 0x11a   :  { %725 = vmatprep.subr.mxu1 %v298_v19 }
 0x11b   :  { %726 = vmatpush3.msra.mxu1 %v298_v19 }
 0x11c   :  { %727 = vmatprep.subr.mxu1 %v297_v21 }
 0x11d   :  { %728 = vmatpush3.msra.mxu1 %v297_v21 }
 0x11e   :  { %729 = vmatprep.subr.mxu1 %v296_v23 }
 0x11f   :  { %730 = vmatpush3.msra.mxu1 %v296_v23  ;;  %v553_v23 = vpop.permute.xlu0 %552 }
 0x120   :  { %731 = vmatprep.subr.mxu1 %v295_v24 }
 0x121   :  { %732 = vmatpush3.msra.mxu1 %v295_v24 }
 0x122   :  { %733 = vmatprep.subr.mxu1 %v294_v25 }
 0x123   :  { %734 = vmatpush3.msra.mxu1 %v294_v25 }
 0x124   :  { %736 = vmatmul.mubr.msk.f32.vlgmr.msra.gmra.mxu1 %vm358_vm1, %v303_v26 }
 0x125   :  { %738 = vmatprep.mubr.msk.f32.mxu1 %vm358_vm1, %v304_v27 }
 0x128   :  { %739 = vmatmul.mubr.msk.f32.gmra.mxu1 %vm358_vm1, %v305_v28  ;;  %v558_v28 = vpop.permute.xlu1 %557 }
 0x129   :  { %741 = vmatprep.mubr.msk.f32.mxu1 %vm358_vm1, %v306_v29 }
 0x12c   :  { %742 = vmatmul.mubr.msk.f32.gmra.mxu1 %vm358_vm1, %v307_v30 }
 0x12d   :  { %744 = vmatprep.mubr.msk.f32.mxu1 %vm358_vm1, %v308_v31 }
 0x130   :  { %745 = vmatmul.mubr.msk.f32.gmra.mxu1 %vm358_vm1, %v309_v32 }
 0x1e4   :  { %v737_v42 = vpop.f32.mrf.mxu1 }
 0x1e5   :  { %v455_v43 = vadd.f32 %v737_v42, %v326_v34 }
 0x1e6   :  { %v449_v44 = vpop.f32.mrf.mxu1 }
 0x1e7   :  { %v497_v46 = vmul.f32 0.2, %v455_v43  ;;  %v450_v47 = vadd.f32 %v449_v44, %v321_v33  ;;  %vm489_vm10 = vcmp.gt.f32.partialorder %v455_v43, 0.0 }
 0x1e8   :  { %v740_v48 = vpop.f32.mrf.mxu1 }
 0x1e9   :  { %vm488_vm11 = vcmp.gt.f32.partialorder %v450_v47, 0.0  ;;  %v496_v49 = vmul.f32 0.2, %v450_v47  ;;  %v465_v50 = vadd.f32 %v740_v48, %v336_v36  ;;  %v505_v53 = vsel %vm489_vm10, %v455_v43, %v497_v46 }
 0x1ea   :  { %v459_v52 = vpop.f32.mrf.mxu1  ;;  %v561_v62 = vmul.f32 %v528_v38, %v505_v53 }
 0x1eb   :  { %v504_v54 = vsel %vm488_vm11, %v450_v47, %v496_v49  ;;  %v499_v55 = vmul.f32 0.2, %v465_v50  ;;  %v460_v56 = vadd.f32 %v459_v52, %v331_v35  ;;  %vm491_vm12 = vcmp.gt.f32.partialorder %v465_v50, 0.0 }
 0x1ec   :  { %v560_v57 = vmul.f32 %v523_v37, %v504_v54  ;;  %v743_v58 = vpop.f32.mrf.mxu1  ;;  %v582_v37 = vstv %s1045_s6 }
 0x1ed   :  { %vm490_vm13 = vcmp.gt.f32.partialorder %v460_v56, 0.0  ;;  %v498_v60 = vmul.f32 0.2, %v460_v56  ;;  %v475_v61 = vadd.f32 %v743_v58, %v346_v41  ;;  %v507_v0 = vsel %vm491_vm12, %v465_v50, %v499_v55 }
 0x1ee   :  { %v469_v63 = vpop.f32.mrf.mxu1  ;;  %v568_v5 = vadd.f32 %v561_v62, %v560_v57  ;;  %v563_v10 = vmul.f32 %v538_v45, %v507_v0 }
 0x1ef   :  { %v506_v1 = vsel %vm490_vm13, %v460_v56, %v498_v60  ;;  %v501_v2 = vmul.f32 0.2, %v475_v61  ;;  %v470_v3 = vadd.f32 %v469_v63, %v341_v39  ;;  %vm493_vm14 = vcmp.gt.f32.partialorder %v475_v61, 0.0 }
 0x1f0   :  { %v562_v6 = vmul.f32 %v533_v40, %v506_v1  ;;  %v746_v7 = vpop.f32.mrf.mxu1 }
 0x1f1   :  { %vm492_vm15 = vcmp.gt.f32.partialorder %v470_v3, 0.0  ;;  %v500_v8 = vmul.f32 0.2, %v470_v3  ;;  %v485_v9 = vadd.f32 %v746_v7, %v356_v4  ;;  %v509_v14 = vsel %vm493_vm14, %v475_v61, %v501_v2 }
 0x1f2   :  { %v569_v11 = vadd.f32 %v568_v5, %v562_v6  ;;  %v479_v12 = vpop.f32.mrf.mxu1  ;;  %v565_v21 = vmul.f32 %v548_v13, %v509_v14 }
 0x1f3   :  { %v508_v15 = vsel %vm492_vm15, %v470_v3, %v500_v8  ;;  %v503_v16 = vmul.f32 0.2, %v485_v9  ;;  %v480_v17 = vadd.f32 %v479_v12, %v351_v51  ;;  %vm495_vm0 = vcmp.gt.f32.partialorder %v485_v9, 0.0 }
 0x1f4   :  { %v564_v18 = vmul.f32 %v543_v59, %v508_v15  ;;  %v570_v19 = vadd.f32 %v569_v11, %v563_v10 }
 0x1f5   :  { %vm494_vm1 = vcmp.gt.f32.partialorder %v480_v17, 0.0  ;;  %v502_v20 = vmul.f32 0.2, %v480_v17  ;;  %v511_v24 = vsel %vm495_vm0, %v485_v9, %v503_v16 }
 0x1f6   :  { %v571_v22 = vadd.f32 %v570_v19, %v564_v18  ;;  %v567_v29 = vmul.f32 %v558_v28, %v511_v24 }
 0x1f7   :  { %v510_v25 = vsel %vm494_vm1, %v480_v17, %v502_v20 }
 0x1f8   :  { %v566_v26 = vmul.f32 %v553_v23, %v510_v25  ;;  %v572_v27 = vadd.f32 %v571_v22, %v565_v21 }
 0x1fa   :  { %v573_v30 = vadd.f32 %v572_v27, %v566_v26 }
 0x1fc   :  { %v574_v31 = vadd.f32 %v573_v30, %v567_v29 }
 0x1fe   :  { %v575_v32 = vrot.slane %v574_v31, 4 }
 0x200   :  { %v576_v33 = vadd.f32 %v575_v32, %v574_v31 }
 0x202   :  { %v577_v34 = vrot.slane %v576_v33, 2 }
 0x204   :  { %v578_v35 = vadd.f32 %v577_v34, %v576_v33 }
 0x206   :  { %v579_v36 = vrot.slane %v578_v35, 1 }
 0x208   :  { %v580_v38 = vadd.f32 %v579_v36, %v578_v35 }
 0x20a   :  { %v583_v39 = vadd.f32 %v582_v37, %v580_v38 }
 0x20c   :  { %v584_v40 = vmul.f32 0.5, %v583_v39 }
 0x20e   :  { %751 = vtanh.f32 %v584_v40 }
 0x21b   :  { %v752_v41 = vpop.eup %751 }
 0x21c   :  { %v586_v42 = vadd.f32 1.0, %v752_v41 }
 0x21e   :  { %v587_v43 = vmul.f32 0.5, %v586_v42 }
 0x220   :  { %588 = vst [vmem:[#allocation3] sm:$0x1] %v587_v43 }
 0x221   :  { %764 = shalt.err (!%p761_p4)
}
 0x222   :  { %598 = dma.vmem_to_hbm [thread:$0]  %s596_s2, 16, %s1046_s7, [#allocation4]  }
 0x223   :  { %773 = dma.done.wait [#allocation4], 16  }
 0x224   :  { %774 = vsyncadd [#allocation4], 4294967280 }
 0x225   :  { %602 = vsyncpa [#allocation4], 1 }

</bundles_post_ra>
